<compile_context>
chip_gen: v7x
topology: tpu7x:2x2x1
jax: 0.10.0
libtpu: 0.0.40
codegen_flags: <defaults>
</compile_context>

<pallas_src>
import functools

import jax
import jax.numpy as jnp
from jax.experimental import pallas as pl
from jax.experimental.pallas import tpu as pltpu


def _decoder_kernel(ids_ref,      # SMEM (T_pad,) int32 token ids (scalar prefetch)
                    emb_ref,      # VMEM (V, Hpad) f32 lane-padded embedding table
                    w_gru_ref,    # VMEM (L, Hpad+8, 4*Hpad) f32: W_ih^T gate blocks + bias row
                    w_out_ref,    # VMEM (Hpad+8, Vpad) f32: W_out^T + bias row (pad lanes -1e30)
                    out_ref):     # VMEM (TB, Vpad) f32 log-probs for this token chunk
    Hpad = emb_ref.shape[1]
    n_layers = w_gru_ref.shape[0]
    TB = out_ref.shape[0]
    base = pl.program_id(0) * TB

    # Gather the TB embedding rows for this chunk from the VMEM-resident padded table
    # (the .view(1,1,-1) in PyTorch just keeps each one a row vector).
    rows = [emb_ref[pl.ds(ids_ref[base + i], 1), :] for i in range(TB)]
    x = jnp.concatenate(rows, axis=0)                                    # (TB, Hpad) f32

    # Multi-layer GRU, seq_len = 1, h0 = 0 (PyTorch default when h is not passed).
    # With h_prev == 0 the recurrent matmul collapses: gh == b_hh and
    # h_new = (1 - z) * n.  Exact for this module; W_hh only reaches the output
    # through b_hh (packed into the bias row below).  Padded lanes stay exactly 0.
    for layer in range(n_layers):
        w = w_gru_ref[layer, 0:Hpad, :]                                  # (Hpad, 4*Hpad)
        b = w_gru_ref[layer, Hpad:Hpad + 1, :]                           # (1, 4*Hpad)
        g = jnp.dot(x, w, preferred_element_type=jnp.float32) + b        # (TB, 4*Hpad)
        r = jax.nn.sigmoid(g[:, 0:Hpad])
        z = jax.nn.sigmoid(g[:, Hpad:2 * Hpad])
        n = jnp.tanh(g[:, 2 * Hpad:3 * Hpad] + r * g[:, 3 * Hpad:4 * Hpad])
        x = (1.0 - z) * n                                                # (TB, Hpad)

    # Output projection; bias is the extra row of the slab (padded vocab lanes = -1e30).
    wo = w_out_ref[0:Hpad, :]
    bo = w_out_ref[Hpad:Hpad + 1, :]
    logits = jnp.dot(x, wo, preferred_element_type=jnp.float32) + bo     # (TB, Vpad)

    # TODO(synk): nn.LogSoftmax() with its deprecated implicit dim would pick dim=0
    # (size 1) of the 3-D tensor and return all zeros; we implement the clearly
    # intended log-softmax over the vocabulary dimension instead.
    m = jnp.max(logits, axis=-1, keepdims=True)
    s = jnp.sum(jnp.exp(logits - m), axis=-1, keepdims=True)
    out_ref[...] = logits - m - jnp.log(s)


def prepare_params(params, *, hidden_size, n_layers):
    """One-time packing of PyTorch-layout params into kernel-friendly padded buffers."""
    emb, w_ih, w_hh, b_ih, b_hh, w_out, b_out = params
    H, L = hidden_size, n_layers
    V, E = emb.shape
    assert E == H, "nn.GRU(hidden, hidden) requires embedding_size == hidden_size"
    Hpad = ((H + 127) // 128) * 128
    Vpad = ((V + 127) // 128) * 128

    # Embedding table, lane-padded (pad lanes 0 so hidden pad lanes stay exactly 0).
    emb_p = jnp.zeros((V, Hpad), jnp.float32).at[:, :H].set(emb.astype(jnp.float32))

    # Per-layer slab: rows 0..Hpad-1 = W_ih^T in 128-aligned gate blocks [r|z|n|0],
    # row Hpad = bias row [b_ir+b_hr | b_iz+b_hz | b_in | b_hn], remaining pad rows 0.
    # W_hh itself is dead with h0 == 0 (only b_hh matters); see kernel comment.
    del w_hh
    w_gru = jnp.zeros((L, Hpad + 8, 4 * Hpad), jnp.float32)
    for l in range(L):
        for g in range(3):  # PyTorch gate order: r, z, n
            wt = jnp.transpose(w_ih[l, g * H:(g + 1) * H, :]).astype(jnp.float32)
            w_gru = w_gru.at[l, 0:H, g * Hpad:g * Hpad + H].set(wt)
        b_r = b_ih[l, 0, 0:H] + b_hh[l, 0, 0:H]
        b_z = b_ih[l, 0, H:2 * H] + b_hh[l, 0, H:2 * H]
        b_in = b_ih[l, 0, 2 * H:3 * H]
        b_hn = b_hh[l, 0, 2 * H:3 * H]
        w_gru = w_gru.at[l, Hpad, 0:H].set(b_r)
        w_gru = w_gru.at[l, Hpad, Hpad:Hpad + H].set(b_z)
        w_gru = w_gru.at[l, Hpad, 2 * Hpad:2 * Hpad + H].set(b_in)
        w_gru = w_gru.at[l, Hpad, 3 * Hpad:3 * Hpad + H].set(b_hn)

    # Output projection slab: rows 0..Hpad-1 = W_out^T (lane-padded with 0),
    # row Hpad = bias, padded vocab lanes = -1e30 so they never win max / add to sum.
    w_out_aug = jnp.zeros((Hpad + 8, Vpad), jnp.float32)
    w_out_aug = w_out_aug.at[0:H, 0:V].set(jnp.transpose(w_out).astype(jnp.float32))
    bias_row = jnp.full((Vpad,), -1e30, jnp.float32).at[0:V].set(b_out[0])
    w_out_aug = w_out_aug.at[Hpad, :].set(bias_row)

    return emb_p, w_gru, w_out_aug


def decoder_forward(token_ids, prepared, *, output_size, tokens_per_block=8):
    """Runs the module's forward for each token id in `token_ids` (shape (T,)).

    Each token is an independent forward pass (fresh h0 = 0, seq_len = 1), exactly
    like the PyTorch module; returns log-probs of shape (T, 1, 1, output_size).
    NOTE: this is NOT a stateful decoder -- no hidden state is carried across tokens.
    """
    emb_p, w_gru, w_out_aug = prepared
    V = output_size
    Vpad = w_out_aug.shape[1]
    TB = tokens_per_block
    T = token_ids.shape[0]
    T_pad = ((T + TB - 1) // TB) * TB

    ids = token_ids.astype(jnp.int32)
    if T_pad != T:
        ids = jnp.pad(ids, (0, T_pad - T))  # padded slots reuse token 0; sliced off below

    # TODO(synk): at production sizes (large H / V) tile the output projection over a
    # vocab grid axis with a running-max/sum log-softmax instead of one (Hpad, Vpad)
    # block, so it fits v7x's 64 MiB VMEM.
    logp = pl.pallas_call(
        _decoder_kernel,
        out_shape=jax.ShapeDtypeStruct((T_pad, Vpad), jnp.float32),
        grid_spec=pltpu.PrefetchScalarGridSpec(
            num_scalar_prefetch=1,
            grid=(T_pad // TB,),
            in_specs=[
                pl.BlockSpec(emb_p.shape, lambda t, idx: (0, 0)),       # VMEM-resident
                pl.BlockSpec(w_gru.shape, lambda t, idx: (0, 0, 0)),    # VMEM-resident
                pl.BlockSpec(w_out_aug.shape, lambda t, idx: (0, 0)),   # VMEM-resident
            ],
            out_specs=pl.BlockSpec((TB, Vpad), lambda t, idx: (t, 0)),
        ),
        compiler_params=pltpu.CompilerParams(
            dimension_semantics=("parallel",)),
    )(ids, emb_p, w_gru, w_out_aug)

    # Match the PyTorch per-token output shape (seq=1, batch=1, output_size).
    return logp[:T, :V].reshape(T, 1, 1, V)


def init_params(key, hidden_size, embedding_size, output_size, n_layers):
    """Deterministic synthetic parameters matching the nn.Module shapes (PyTorch layout)."""
    H, E, V, L = hidden_size, embedding_size, output_size, n_layers
    ks = jax.random.split(key, 7)
    bound = 1.0 / (H ** 0.5)
    u = lambda k, shape: jax.random.uniform(k, shape, jnp.float32, -bound, bound)

    emb = jax.random.normal(ks[0], (V, E), jnp.float32)      # nn.Embedding ~ N(0, 1)
    w_ih = u(ks[1], (L, 3 * H, H))                           # gru.weight_ih_l{l}
    w_hh = u(ks[2], (L, 3 * H, H))                           # gru.weight_hh_l{l}
    b_ih = u(ks[3], (L, 1, 3 * H))                           # gru.bias_ih_l{l}
    b_hh = u(ks[4], (L, 1, 3 * H))                           # gru.bias_hh_l{l}
    w_out = u(ks[5], (V, H))                                 # out.weight
    b_out = u(ks[6], (1, V))                                 # out.bias
    return emb, w_ih, w_hh, b_ih, b_hh, w_out, b_out


if __name__ == "__main__":
    hidden_size = 32
    embedding_size = 32   # must equal hidden_size for nn.GRU(hidden, hidden) to accept it
    output_size = 64      # vocabulary size
    n_layers = 2

    key = jax.random.PRNGKey(0)
    params = init_params(key, hidden_size, embedding_size, output_size, n_layers)

    # One-time parameter preparation (hoisted out of the per-step forward).
    prepared = prepare_params(params, hidden_size=hidden_size, n_layers=n_layers)

    # 8 independent decode-step token ids processed by a single pallas_call.
    tokens = jnp.array([5, 0, 17, 63, 1, 2, 33, 40], dtype=jnp.int32)

    fwd = jax.jit(functools.partial(decoder_forward, output_size=output_size))
    out = fwd(tokens, prepared)
    out = jax.block_until_ready(out)

    assert out.shape == (tokens.shape[0], 1, 1, output_size), out.shape
    sums = jnp.exp(out).sum(axis=-1)                  # each row must be a distribution
    assert bool(jnp.all(jnp.abs(sums - 1.0) < 1e-3)), sums
    print("KERNEL_OK")
</pallas_src>

<mosaic_0001>
module attributes {stable_mosaic.version = 11 : i64} {
  func.func @_decoder_kernel(%arg0: i32, %arg1: memref<8xi32, #tpu.memory_space<smem>>, %arg2: memref<64x128xf32, #tpu.memory_space<vmem>>, %arg3: memref<2x136x512xf32, #tpu.memory_space<vmem>>, %arg4: memref<136x128xf32, #tpu.memory_space<vmem>>, %arg5: memref<8x128xf32, #tpu.memory_space<vmem>>) attributes {dimension_semantics = [#tpu.dimension_semantics<parallel>], iteration_bounds = array<i64: 1>, scalar_prefetch = 1 : i64, scratch_operands = 0 : i64, tpu.core_type = #tpu.core_type<tc>, window_params = [{pipeline_mode = #tpu.pipeline_mode<synchronous>, transform_indices = @transform_0, window_bounds = array<i64: 64, 128>}, {pipeline_mode = #tpu.pipeline_mode<synchronous>, transform_indices = @transform_1, window_bounds = array<i64: 2, 136, 512>}, {pipeline_mode = #tpu.pipeline_mode<synchronous>, transform_indices = @transform_2, window_bounds = array<i64: 136, 128>}, {transform_indices = @transform_3, window_bounds = array<i64: 8, 128>}]} {
    %c8_i32 = arith.constant 8 : i32
    %0 = arith.muli %arg0, %c8_i32 : i32
    %c0_i32 = arith.constant 0 : i32
    %1 = arith.addi %0, %c0_i32 : i32
    %2 = arith.index_cast %1 : i32 to index
    %3 = memref.load %arg1[%2] : memref<8xi32, #tpu.memory_space<smem>>
    %4 = arith.index_cast %3 : i32 to index
    %c0 = arith.constant 0 : index
    %5 = vector.load %arg2[%4, %c0] : memref<64x128xf32, #tpu.memory_space<vmem>>, vector<1x128xf32>
    %c1_i32 = arith.constant 1 : i32
    %6 = arith.addi %0, %c1_i32 : i32
    %7 = arith.index_cast %6 : i32 to index
    %8 = memref.load %arg1[%7] : memref<8xi32, #tpu.memory_space<smem>>
    %9 = arith.index_cast %8 : i32 to index
    %c0_0 = arith.constant 0 : index
    %10 = vector.load %arg2[%9, %c0_0] : memref<64x128xf32, #tpu.memory_space<vmem>>, vector<1x128xf32>
    %c2_i32 = arith.constant 2 : i32
    %11 = arith.addi %0, %c2_i32 : i32
    %12 = arith.index_cast %11 : i32 to index
    %13 = memref.load %arg1[%12] : memref<8xi32, #tpu.memory_space<smem>>
    %14 = arith.index_cast %13 : i32 to index
    %c0_1 = arith.constant 0 : index
    %15 = vector.load %arg2[%14, %c0_1] : memref<64x128xf32, #tpu.memory_space<vmem>>, vector<1x128xf32>
    %c3_i32 = arith.constant 3 : i32
    %16 = arith.addi %0, %c3_i32 : i32
    %17 = arith.index_cast %16 : i32 to index
    %18 = memref.load %arg1[%17] : memref<8xi32, #tpu.memory_space<smem>>
    %19 = arith.index_cast %18 : i32 to index
    %c0_2 = arith.constant 0 : index
    %20 = vector.load %arg2[%19, %c0_2] : memref<64x128xf32, #tpu.memory_space<vmem>>, vector<1x128xf32>
    %c4_i32 = arith.constant 4 : i32
    %21 = arith.addi %0, %c4_i32 : i32
    %22 = arith.index_cast %21 : i32 to index
    %23 = memref.load %arg1[%22] : memref<8xi32, #tpu.memory_space<smem>>
    %24 = arith.index_cast %23 : i32 to index
    %c0_3 = arith.constant 0 : index
    %25 = vector.load %arg2[%24, %c0_3] : memref<64x128xf32, #tpu.memory_space<vmem>>, vector<1x128xf32>
    %c5_i32 = arith.constant 5 : i32
    %26 = arith.addi %0, %c5_i32 : i32
    %27 = arith.index_cast %26 : i32 to index
    %28 = memref.load %arg1[%27] : memref<8xi32, #tpu.memory_space<smem>>
    %29 = arith.index_cast %28 : i32 to index
    %c0_4 = arith.constant 0 : index
    %30 = vector.load %arg2[%29, %c0_4] : memref<64x128xf32, #tpu.memory_space<vmem>>, vector<1x128xf32>
    %c6_i32 = arith.constant 6 : i32
    %31 = arith.addi %0, %c6_i32 : i32
    %32 = arith.index_cast %31 : i32 to index
    %33 = memref.load %arg1[%32] : memref<8xi32, #tpu.memory_space<smem>>
    %34 = arith.index_cast %33 : i32 to index
    %c0_5 = arith.constant 0 : index
    %35 = vector.load %arg2[%34, %c0_5] : memref<64x128xf32, #tpu.memory_space<vmem>>, vector<1x128xf32>
    %c7_i32 = arith.constant 7 : i32
    %36 = arith.addi %0, %c7_i32 : i32
    %37 = arith.index_cast %36 : i32 to index
    %38 = memref.load %arg1[%37] : memref<8xi32, #tpu.memory_space<smem>>
    %39 = arith.index_cast %38 : i32 to index
    %c0_6 = arith.constant 0 : index
    %40 = vector.load %arg2[%39, %c0_6] : memref<64x128xf32, #tpu.memory_space<vmem>>, vector<1x128xf32>
    %41 = tpu.concatenate %5, %10, %15, %20, %25, %30, %35, %40 in 0 : vector<1x128xf32>, vector<1x128xf32>, vector<1x128xf32>, vector<1x128xf32>, vector<1x128xf32>, vector<1x128xf32>, vector<1x128xf32>, vector<1x128xf32> -> vector<8x128xf32>
    %c0_7 = arith.constant 0 : index
    %c0_8 = arith.constant 0 : index
    %c0_9 = arith.constant 0 : index
    %42 = vector.load %arg3[%c0_7, %c0_8, %c0_9] : memref<2x136x512xf32, #tpu.memory_space<vmem>>, vector<1x128x512xf32>
    %43 = vector.shape_cast %42 : vector<1x128x512xf32> to vector<128x512xf32>
    %c0_10 = arith.constant 0 : index
    %c128 = arith.constant 128 : index
    %c0_11 = arith.constant 0 : index
    %44 = vector.load %arg3[%c0_10, %c128, %c0_11] : memref<2x136x512xf32, #tpu.memory_space<vmem>>, vector<1x1x512xf32>
    %45 = vector.shape_cast %44 : vector<1x1x512xf32> to vector<1x512xf32>
    %cst = arith.constant dense<0.000000e+00> : vector<8x512xf32>
    %46 = tpu.matmul %41, %43, %cst {dimension_numbers = #tpu.dot_dimension_numbers<[1], [0], [0], [1], [0, 0, 1, 1], [], []>} : vector<8x128xf32>, vector<128x512xf32>, vector<8x512xf32> -> vector<8x512xf32>
    %47 = vector.broadcast %45 : vector<1x512xf32> to vector<8x512xf32>
    %48 = arith.addf %46, %47 : vector<8x512xf32>
    %49 = vector.extract_strided_slice %48 {offsets = [0, 0], sizes = [8, 128], strides = [1, 1]} : vector<8x512xf32> to vector<8x128xf32>
    %50 = arith.negf %49 : vector<8x128xf32>
    %51 = math.exp %50 : vector<8x128xf32>
    %cst_12 = arith.constant 1.000000e+00 : f32
    %52 = vector.broadcast %cst_12 : f32 to vector<8x128xf32>
    %53 = arith.addf %52, %51 : vector<8x128xf32>
    %54 = arith.divf %52, %53 : vector<8x128xf32>
    %55 = vector.extract_strided_slice %48 {offsets = [0, 128], sizes = [8, 128], strides = [1, 1]} : vector<8x512xf32> to vector<8x128xf32>
    %56 = arith.negf %55 : vector<8x128xf32>
    %57 = math.exp %56 : vector<8x128xf32>
    %cst_13 = arith.constant 1.000000e+00 : f32
    %58 = vector.broadcast %cst_13 : f32 to vector<8x128xf32>
    %59 = arith.addf %58, %57 : vector<8x128xf32>
    %60 = arith.divf %58, %59 : vector<8x128xf32>
    %61 = vector.extract_strided_slice %48 {offsets = [0, 256], sizes = [8, 128], strides = [1, 1]} : vector<8x512xf32> to vector<8x128xf32>
    %62 = vector.extract_strided_slice %48 {offsets = [0, 384], sizes = [8, 128], strides = [1, 1]} : vector<8x512xf32> to vector<8x128xf32>
    %63 = arith.mulf %54, %62 : vector<8x128xf32>
    %64 = arith.addf %61, %63 : vector<8x128xf32>
    %65 = math.tanh %64 : vector<8x128xf32>
    %cst_14 = arith.constant 1.000000e+00 : f32
    %66 = vector.broadcast %cst_14 : f32 to vector<8x128xf32>
    %67 = arith.subf %66, %60 : vector<8x128xf32>
    %68 = arith.mulf %67, %65 : vector<8x128xf32>
    %c1 = arith.constant 1 : index
    %c0_15 = arith.constant 0 : index
    %c0_16 = arith.constant 0 : index
    %69 = vector.load %arg3[%c1, %c0_15, %c0_16] : memref<2x136x512xf32, #tpu.memory_space<vmem>>, vector<1x128x512xf32>
    %70 = vector.shape_cast %69 : vector<1x128x512xf32> to vector<128x512xf32>
    %c1_17 = arith.constant 1 : index
    %c128_18 = arith.constant 128 : index
    %c0_19 = arith.constant 0 : index
    %71 = vector.load %arg3[%c1_17, %c128_18, %c0_19] : memref<2x136x512xf32, #tpu.memory_space<vmem>>, vector<1x1x512xf32>
    %72 = vector.shape_cast %71 : vector<1x1x512xf32> to vector<1x512xf32>
    %cst_20 = arith.constant dense<0.000000e+00> : vector<8x512xf32>
    %73 = tpu.matmul %68, %70, %cst_20 {dimension_numbers = #tpu.dot_dimension_numbers<[1], [0], [0], [1], [0, 0, 1, 1], [], []>} : vector<8x128xf32>, vector<128x512xf32>, vector<8x512xf32> -> vector<8x512xf32>
    %74 = vector.broadcast %72 : vector<1x512xf32> to vector<8x512xf32>
    %75 = arith.addf %73, %74 : vector<8x512xf32>
    %76 = vector.extract_strided_slice %75 {offsets = [0, 0], sizes = [8, 128], strides = [1, 1]} : vector<8x512xf32> to vector<8x128xf32>
    %77 = arith.negf %76 : vector<8x128xf32>
    %78 = math.exp %77 : vector<8x128xf32>
    %cst_21 = arith.constant 1.000000e+00 : f32
    %79 = vector.broadcast %cst_21 : f32 to vector<8x128xf32>
    %80 = arith.addf %79, %78 : vector<8x128xf32>
    %81 = arith.divf %79, %80 : vector<8x128xf32>
    %82 = vector.extract_strided_slice %75 {offsets = [0, 128], sizes = [8, 128], strides = [1, 1]} : vector<8x512xf32> to vector<8x128xf32>
    %83 = arith.negf %82 : vector<8x128xf32>
    %84 = math.exp %83 : vector<8x128xf32>
    %cst_22 = arith.constant 1.000000e+00 : f32
    %85 = vector.broadcast %cst_22 : f32 to vector<8x128xf32>
    %86 = arith.addf %85, %84 : vector<8x128xf32>
    %87 = arith.divf %85, %86 : vector<8x128xf32>
    %88 = vector.extract_strided_slice %75 {offsets = [0, 256], sizes = [8, 128], strides = [1, 1]} : vector<8x512xf32> to vector<8x128xf32>
    %89 = vector.extract_strided_slice %75 {offsets = [0, 384], sizes = [8, 128], strides = [1, 1]} : vector<8x512xf32> to vector<8x128xf32>
    %90 = arith.mulf %81, %89 : vector<8x128xf32>
    %91 = arith.addf %88, %90 : vector<8x128xf32>
    %92 = math.tanh %91 : vector<8x128xf32>
    %cst_23 = arith.constant 1.000000e+00 : f32
    %93 = vector.broadcast %cst_23 : f32 to vector<8x128xf32>
    %94 = arith.subf %93, %87 : vector<8x128xf32>
    %95 = arith.mulf %94, %92 : vector<8x128xf32>
    %c0_24 = arith.constant 0 : index
    %c0_25 = arith.constant 0 : index
    %96 = vector.load %arg4[%c0_24, %c0_25] : memref<136x128xf32, #tpu.memory_space<vmem>>, vector<128x128xf32>
    %c128_26 = arith.constant 128 : index
    %c0_27 = arith.constant 0 : index
    %97 = vector.load %arg4[%c128_26, %c0_27] : memref<136x128xf32, #tpu.memory_space<vmem>>, vector<1x128xf32>
    %cst_28 = arith.constant dense<0.000000e+00> : vector<8x128xf32>
    %98 = tpu.matmul %95, %96, %cst_28 {dimension_numbers = #tpu.dot_dimension_numbers<[1], [0], [0], [1], [0, 0, 1, 1], [], []>} : vector<8x128xf32>, vector<128x128xf32>, vector<8x128xf32> -> vector<8x128xf32>
    %99 = vector.broadcast %97 : vector<1x128xf32> to vector<8x128xf32>
    %100 = arith.addf %98, %99 : vector<8x128xf32>
    %cst_29 = arith.constant dense<0xFF800000> : vector<8xf32>
    %101 = vector.multi_reduction <maximumf>, %100, %cst_29 [1] : vector<8x128xf32> to vector<8xf32>
    %102 = vector.shape_cast %101 : vector<8xf32> to vector<8x1xf32>
    %103 = vector.broadcast %102 : vector<8x1xf32> to vector<8x128xf32>
    %104 = arith.subf %100, %103 : vector<8x128xf32>
    %105 = math.exp %104 : vector<8x128xf32>
    %cst_30 = arith.constant dense<0.000000e+00> : vector<8xf32>
    %106 = vector.multi_reduction <add>, %105, %cst_30 [1] : vector<8x128xf32> to vector<8xf32>
    %107 = vector.shape_cast %106 : vector<8xf32> to vector<8x1xf32>
    %108 = vector.broadcast %102 : vector<8x1xf32> to vector<8x128xf32>
    %109 = arith.subf %100, %108 : vector<8x128xf32>
    %110 = math.log %107 : vector<8x1xf32>
    %111 = vector.broadcast %110 : vector<8x1xf32> to vector<8x128xf32>
    %112 = arith.subf %109, %111 : vector<8x128xf32>
    %c0_31 = arith.constant 0 : index
    %c0_32 = arith.constant 0 : index
    %113 = vector.load %arg5[%c0_31, %c0_32] : memref<8x128xf32, #tpu.memory_space<vmem>>, vector<8x128xf32>
    tpu.vector_store %arg5[%c0_31, %c0_32], %112 {strides = array<i32>} : memref<8x128xf32, #tpu.memory_space<vmem>>, vector<8x128xf32>,
    return
  }
  func.func @transform_0(%arg0: i32, %arg1: memref<8xi32, #tpu.memory_space<smem>>) -> (i32, i32) {
    %c0_i32 = arith.constant 0 : i32
    %c0_i32_0 = arith.constant 0 : i32
    %c0_i32_1 = arith.constant 0 : i32
    return %c0_i32, %c0_i32_0 : i32, i32
  }
  func.func @transform_1(%arg0: i32, %arg1: memref<8xi32, #tpu.memory_space<smem>>) -> (i32, i32, i32) {
    %c0_i32 = arith.constant 0 : i32
    %c0_i32_0 = arith.constant 0 : i32
    %c0_i32_1 = arith.constant 0 : i32
    %c0_i32_2 = arith.constant 0 : i32
    return %c0_i32, %c0_i32_0, %c0_i32_1 : i32, i32, i32
  }
  func.func @transform_2(%arg0: i32, %arg1: memref<8xi32, #tpu.memory_space<smem>>) -> (i32, i32) {
    %c0_i32 = arith.constant 0 : i32
    %c0_i32_0 = arith.constant 0 : i32
    %c0_i32_1 = arith.constant 0 : i32
    return %c0_i32, %c0_i32_0 : i32, i32
  }
  func.func @transform_3(%arg0: i32, %arg1: memref<8xi32, #tpu.memory_space<smem>>) -> (i32, i32) {
    %c0_i32 = arith.constant 0 : i32
    %c0_i32_0 = arith.constant 0 : i32
    return %arg0, %c0_i32 : i32, i32
  }
}

</mosaic_0001>

<bundles_post_ra>
// kernel: decoder_forward.1
= control target key start
LH: loop header
LB: loop body
LE: loop exit
PB: predicated region body
PF: predicated region fallthrough
CT: control target
= control target key end

     0   :  { %s1257_s0 = inlined_call_operand.hbm [shape: s32[8], index: 0, kind: input, shape index: {}]   ;;  %s1258_s1 = inlined_call_operand.hbm [shape: f32[64,128], index: 1, kind: input, shape index: {}]   ;;  %s1259_s2 = inlined_call_operand.hbm [shape: f32[2,136,512], index: 2, kind: input, shape index: {}]   ;;  %s1260_s3 = inlined_call_operand.hbm [shape: f32[136,128], index: 3, kind: input, shape index: {}]   ;;  %s1261_s4 = inlined_call_operand.hbm [shape: f32[8,128], index: 4, kind: output, shape index: {}]  }
   0x1   :  { %s1000_s17 = scalar_lea.hbm %s1257_s0, 16 }
   0x2   :  { %p1001_p0 = scmp.ne.s32.totalorder %s1257_s0, %s1000_s17  ;;  %p1004_p1 = scmp.lt.u32.totalorder %s1000_s17, %s1257_s0 }
   0x4   :  { %p1006_p2 = pnand %p1004_p1, %p1001_p0 }
   0x6   :  { %1009 = shalt.err (!%p1006_p2)  }
   0x7   :  { %s1106_s22 = smov [#allocation3]  }
   0x8   :  { %10 = dma.hbm_to_smem %s1257_s0, 16, %s1106_s22, [#allocation2] }
   0x9   :  { %1098 = dma.done.wait [#allocation2], 16 }
   0xa   :  { %1099 = vsyncadd [#allocation2], 4294967280 }
   0xb   :  { %12 = sfence }
   0xc   :  { %13 = vsyncpa [#allocation5], 0 }
   0xd   :  { %14 = vsyncpa [#allocation8], 0 }
   0xe   :  { %15 = vsyncpa [#allocation6], 0  ;;  %s1107_s25 = smov [#allocation7]   ;;  %s1010_s29 = scalar_lea.hbm %s1259_s2, 17408 }
   0xf   :  { %s33_s26 = sshll.u32 %s1107_s25, 4  ;;  %p1011_p3 = scmp.ne.s32.totalorder %s1259_s2, %s1010_s29  ;;  %s34_s26 = int_to_ptr.vmem [resolvable:$true] %s33_s26 }
  0x10   :  { %p1014_p4 = scmp.lt.u32.totalorder %s1010_s29, %s1259_s2 }
  0x12   :  { %p1016_p5 = pnand %p1014_p4, %p1011_p3 }
  0x14   :  { %1019 = shalt.err (!%p1016_p5)
}
  0x15   :  { %s1020_s0 = scalar_lea.vmem %s34_s26, 17408  ;;  %p1025_p7 = scmp.lt.s32.totalorder %s34_s26, %s34_s26 }
  0x16   :  { %p1021_p6 = scmp.ne.s32.totalorder %s34_s26, %s1020_s0  ;;  %p1026_p8 = scmp.lt.s32.totalorder %s1020_s0, %s1020_s0 }
  0x18   :  { %p1027_p9 = por %p1026_p8, %p1025_p7 }
  0x1a   :  { %p1028_p10 = pnand %p1027_p9, %p1021_p6 }
  0x1c   :  { %1031 = shalt.err (!%p1028_p10)
}
  0x1d   :  { %s1108_s8 = smov 512   ;;  %s1109_s9 = smov 32  }
  0x1e   :  { %39 = dma.hbm_to_vmem [thread:$0]  %s1259_s2, 17408, %s34_s26, [#allocation8], %s1108_s8, %s1108_s8, %s1109_s9  }
  0x1f   :  { %s1110_s12 = smov [#allocation4]   ;;  %s1032_s16 = scalar_lea.hbm %s1258_s1, 1024 }
  0x20   :  { %s21_s13 = sshll.u32 %s1110_s12, 4  ;;  %p1033_p11 = scmp.ne.s32.totalorder %s1258_s1, %s1032_s16  ;;  %s22_s13 = int_to_ptr.vmem [resolvable:$true] %s21_s13 }
  0x21   :  { %p1036_p12 = scmp.lt.u32.totalorder %s1032_s16, %s1258_s1 }
  0x23   :  { %p1038_p13 = pnand %p1036_p12, %p1033_p11 }
  0x25   :  { %1041 = shalt.err (!%p1038_p13)
}
  0x26   :  { %s1042_s21 = scalar_lea.vmem %s22_s13, 1024  ;;  %p1047_p1 = scmp.lt.s32.totalorder %s22_s13, %s22_s13 }
  0x27   :  { %p1043_p0 = scmp.ne.s32.totalorder %s22_s13, %s1042_s21  ;;  %p1048_p2 = scmp.lt.s32.totalorder %s1042_s21, %s1042_s21 }
  0x29   :  { %p1049_p3 = por %p1048_p2, %p1047_p1 }
  0x2b   :  { %p1050_p4 = pnand %p1049_p3, %p1043_p0 }
  0x2d   :  { %1053 = shalt.err (!%p1050_p4)
}
  0x2e   :  { %s1111_s2 = smov 128   ;;  %s1112_s22 = smov 8  }
  0x2f   :  { %27 = dma.hbm_to_vmem [thread:$0]  %s1258_s1, 1024, %s22_s13, [#allocation5], %s1111_s2, %s1111_s2, %s1112_s22  }
  0x30   :  { %s1113_s25 = smov [#allocation9]   ;;  %s1054_s29 = scalar_lea.hbm %s1260_s3, 2176 }
  0x31   :  { %s45_s26 = sshll.u32 %s1113_s25, 4  ;;  %p1055_p5 = scmp.ne.s32.totalorder %s1260_s3, %s1054_s29  ;;  %s46_s26 = int_to_ptr.vmem [resolvable:$true] %s45_s26 }
  0x32   :  { %p1058_p6 = scmp.lt.u32.totalorder %s1054_s29, %s1260_s3 }
  0x34   :  { %p1060_p7 = pnand %p1058_p6, %p1055_p5 }
  0x36   :  { %1063 = shalt.err (!%p1060_p7)
}
  0x37   :  { %s1064_s0 = scalar_lea.vmem %s46_s26, 2176  ;;  %p1069_p9 = scmp.lt.s32.totalorder %s46_s26, %s46_s26 }
  0x38   :  { %p1065_p8 = scmp.ne.s32.totalorder %s46_s26, %s1064_s0  ;;  %p1070_p10 = scmp.lt.s32.totalorder %s1064_s0, %s1064_s0 }
  0x3a   :  { %p1071_p11 = por %p1070_p10, %p1069_p9 }
  0x3c   :  { %p1072_p12 = pnand %p1071_p11, %p1065_p8 }
  0x3e   :  { %1075 = shalt.err (!%p1072_p12)
}
  0x3f   :  { %51 = dma.hbm_to_vmem [thread:$0]  %s1260_s3, 2176, %s46_s26, [#allocation8], %s1111_s2, %s1111_s2, %s1112_s22  }
  0x40   :  { %1100 = dma.done.wait [#allocation5], 1024  }
  0x41   :  { %1101 = vsyncadd [#allocation5], 4294966272 }
  0x42   :  { %1102 = dma.done.wait [#allocation8], 19584  }
  0x43   :  { %1103 = vsyncadd [#allocation8], 4294947712  ;;  %v1114_v0 = vmov 0.0   ;;  %v129_v1 = vld [vmem:[#allocation7 + $0x8] sm:$0xff]  ;;  %v128_v3 = vld [vmem:[#allocation7] sm:$0xff]  ;;  %s1193_s3 = sld [smem:[#allocation3 + $0x1]] }
  0x44   :  { %279 = vmatprep.mubr.f32.mxu0 %v1114_v0  ;;  %350 = vmatprep.mubr.f32.mxu1 %v1114_v0  ;;  %v133_v2 = vld [vmem:[#allocation7 + $0x28] sm:$0xff]  ;;  %v132_v5 = vld [vmem:[#allocation7 + $0x20] sm:$0xff]  ;;  %s1195_s9 = sld [smem:[#allocation3 + $0x2]]  ;;  %s1197_s10 = sld [smem:[#allocation3 + $0x3]]  ;;  %v131_v22 = vld [vmem:[#allocation7 + $0x18] sm:$0xff]  ;;  %vm114_vm0 = vcmask 1040384  }
  0x45   :  { %v812_v4 = vpack.c.bf16 %v133_v2, %v129_v1  ;;  %v137_v6 = vld [vmem:[#allocation7 + $0x48] sm:$0xff]  ;;  %v814_v8 = vpack.c.bf16 %v132_v5, %v128_v3  ;;  %v136_v10 = vld [vmem:[#allocation7 + $0x40] sm:$0xff]  ;;  %s1199_s11 = sld [smem:[#allocation3]]  ;;  %s1201_s12 = sld [smem:[#allocation3 + $0x4]]  ;;  %v135_v26 = vld [vmem:[#allocation7 + $0x38] sm:$0xff]  ;;  %vm116_vm1 = vcmask 1041408  }
  0x46   :  { %v141_v7 = vld [vmem:[#allocation7 + $0x68] sm:$0xff]  ;;  %v140_v11 = vld [vmem:[#allocation7 + $0x60] sm:$0xff]  ;;  %s1203_s13 = sld [smem:[#allocation3 + $0x5]]  ;;  %v844_v28 = vpack.c.bf16 %v135_v26, %v131_v22  ;;  %v130_v29 = vld [vmem:[#allocation7 + $0x10] sm:$0xff]  ;;  %s1205_s14 = sld [smem:[#allocation3 + $0x6]]  ;;  %vm118_vm2 = vcmask 1042432  }
  0x47   :  { %v816_v9 = vpack.c.bf16 %v141_v7, %v137_v6  ;;  %v145_v12 = vld [vmem:[#allocation7 + $0x88] sm:$0xff]  ;;  %813 = vmatprep.subr.bf16.mxu0 %v812_v4  ;;  %v818_v14 = vpack.c.bf16 %v140_v11, %v136_v10  ;;  %v144_v16 = vld [vmem:[#allocation7 + $0x80] sm:$0xff]  ;;  %v134_v30 = vld [vmem:[#allocation7 + $0x30] sm:$0xff]  ;;  %s1208_s16 = sld [smem:[#allocation3 + $0x7]]  ;;  %vm120_vm3 = vcmask 1043456   ;;  %vm122_vm4 = vcmask 1044480  }
  0x48   :  { %v149_v13 = vld [vmem:[#allocation7 + $0xa8] sm:$0xff]  ;;  %815 = vmatpush1.bf16.msra.mxu0 %v814_v8  ;;  %v148_v17 = vld [vmem:[#allocation7 + $0xa0] sm:$0xff]  ;;  %v846_v31 = vpack.c.bf16 %v134_v30, %v130_v29  ;;  %v139_v32 = vld [vmem:[#allocation7 + $0x58] sm:$0xff]  ;;  %845 = vmatprep.subr.bf16.mxu1 %v844_v28  ;;  %vm124_vm5 = vcmask 1045504   ;;  %vm126_vm6 = vcmask 1046528   ;;  %vm1116_vm7 = vmmov 0  }
  0x49   :  { %817 = vmatprep.subr.bf16.mxu0 %v816_v9  ;;  %v820_v15 = vpack.c.bf16 %v149_v13, %v145_v12  ;;  %v153_v18 = vld [vmem:[#allocation7 + $0xc8] sm:$0xff]  ;;  %v822_v20 = vpack.c.bf16 %v148_v17, %v144_v16  ;;  %v152_v21 = vld [vmem:[#allocation7 + $0xc0] sm:$0xff]  ;;  %v143_v33 = vld [vmem:[#allocation7 + $0x78] sm:$0xff]  ;;  %s67_s15 = scalar_lea.vmem [#allocation4], %s1193_s3  ;;  %s1117_s23 = smov [#allocation10]  }
  0x4a   :  { %v157_v19 = vld [vmem:[#allocation7 + $0xe8] sm:$0xff]  ;;  %v156_v24 = vld [vmem:[#allocation7 + $0xe0] sm:$0xff]  ;;  %v848_v37 = vpack.c.bf16 %v143_v33, %v139_v32  ;;  %v138_v38 = vld [vmem:[#allocation7 + $0x50] sm:$0xff]  ;;  %847 = vmatpush1.bf16.msra.mxu1 %v846_v31  ;;  %s71_s17 = scalar_lea.vmem [#allocation4], %s1195_s9  ;;  %s75_s18 = scalar_lea.vmem [#allocation4], %s1197_s10 }
  0x4b   :  { %v824_v23 = vpack.c.bf16 %v157_v19, %v153_v18  ;;  %v161_v25 = vld [vmem:[#allocation7 + $0x108] sm:$0xff]  ;;  %v826_v34 = vpack.c.bf16 %v156_v24, %v152_v21  ;;  %v160_v35 = vld [vmem:[#allocation7 + $0x100] sm:$0xff]  ;;  %v142_v41 = vld [vmem:[#allocation7 + $0x70] sm:$0xff]  ;;  %s63_s19 = scalar_lea.vmem [#allocation4], %s1199_s11  ;;  %s79_s20 = scalar_lea.vmem [#allocation4], %s1201_s12 }
  0x4c   :  { %819 = vmatpush1.bf16.msra.mxu0 %v818_v14  ;;  %v165_v27 = vld [vmem:[#allocation7 + $0x128] sm:$0xff]  ;;  %v164_v36 = vld [vmem:[#allocation7 + $0x120] sm:$0xff]  ;;  %849 = vmatprep.subr.bf16.mxu1 %v848_v37  ;;  %v850_v44 = vpack.c.bf16 %v142_v41, %v138_v38  ;;  %v147_v57 = vld [vmem:[#allocation7 + $0x98] sm:$0xff]  ;;  %s83_s21 = scalar_lea.vmem [#allocation4], %s1203_s13  ;;  %s87_s2 = scalar_lea.vmem [#allocation4], %s1205_s14 }
  0x4d   :  { %821 = vmatprep.subr.bf16.mxu0 %v820_v15  ;;  %v828_v39 = vpack.c.bf16 %v165_v27, %v161_v25  ;;  %v169_v40 = vld [vmem:[#allocation7 + $0x148] sm:$0xff]  ;;  %v68_v42 = vld [vmem:[%s67_s15] sm:$0x1]  ;;  %v830_v51 = vpack.c.bf16 %v164_v36, %v160_v35  ;;  %v151_v58 = vld [vmem:[#allocation7 + $0xb8] sm:$0xff]  ;;  %s91_s22 = scalar_lea.vmem [#allocation4], %s1208_s16  ;;  %s729_s24 = sshll.u32 %s1117_s23, 4  ;;  %s730_s24 = int_to_ptr.vmem [resolvable:$true] %s729_s24 }
  0x4e   :  { %v173_v43 = vld [vmem:[#allocation7 + $0x168] sm:$0xff]  ;;  %v72_v45 = vld [vmem:[%s71_s17] sm:$0x1]  ;;  %v94_v54 = vrot.slane %v68_v42, 7  ;;  %851 = vmatpush1.bf16.msra.mxu1 %v850_v44  ;;  %v852_v60 = vpack.c.bf16 %v151_v58, %v147_v57  ;;  %v146_v61 = vld [vmem:[#allocation7 + $0x90] sm:$0xff]  ;;  %s1076_s25 = scalar_lea.vmem %s730_s24, 128  ;;  %p1081_p0 = scmp.lt.s32.totalorder %s730_s24, %s730_s24 }
  0x4f   :  { %v76_v46 = vld [vmem:[%s75_s18] sm:$0x1]  ;;  %v177_v52 = vld [vmem:[#allocation7 + $0x188] sm:$0xff]  ;;  %v97_v55 = vrot.slane %v72_v45, 6  ;;  %v832_v59 = vpack.c.bf16 %v173_v43, %v169_v40  ;;  %v150_v62 = vld [vmem:[#allocation7 + $0xb0] sm:$0xff]  ;;  %p1077_p13 = scmp.ne.s32.totalorder %s730_s24, %s1076_s25  ;;  %p1082_p1 = scmp.lt.s32.totalorder %s1076_s25, %s1076_s25 }
  0x50   :  { %823 = vmatpush1.bf16.msra.mxu0 %v822_v20  ;;  %v168_v47 = vld [vmem:[#allocation7 + $0x140] sm:$0xff]  ;;  %v181_v53 = vld [vmem:[#allocation7 + $0x1a8] sm:$0xff]  ;;  %v100_v56 = vrot.slane %v76_v46, 5  ;;  %v155_v63 = vld [vmem:[#allocation7 + $0xd8] sm:$0xff]  ;;  %v854_v2 = vpack.c.bf16 %v150_v62, %v146_v61  ;;  %853 = vmatprep.subr.bf16.mxu1 %v852_v60 }
  0x51   :  { %825 = vmatprep.subr.bf16.mxu0 %v824_v23  ;;  %v172_v48 = vld [vmem:[#allocation7 + $0x160] sm:$0xff]  ;;  %v159_v3 = vld [vmem:[#allocation7 + $0xf8] sm:$0xff]  ;;  %v154_v4 = vld [vmem:[#allocation7 + $0xd0] sm:$0xff]  ;;  %v836_v15 = vpack.c.bf16 %v181_v53, %v177_v52  ;;  %p1083_p2 = por %p1082_p1, %p1081_p0 }
  0x52   :  { %v64_v49 = vld [vmem:[%s63_s19] sm:$0x1]  ;;  %v158_v5 = vld [vmem:[#allocation7 + $0xf0] sm:$0xff]  ;;  %v856_v9 = vpack.c.bf16 %v159_v3, %v155_v63  ;;  %v163_v10 = vld [vmem:[#allocation7 + $0x118] sm:$0xff]  ;;  %v834_v12 = vpack.c.bf16 %v172_v48, %v168_v47  ;;  %855 = vmatpush1.bf16.msra.mxu1 %v854_v2 }
  0x53   :  { %v80_v50 = vld [vmem:[%s79_s20] sm:$0x1]  ;;  %v115_v1 = vsel %vm114_vm0, %v64_v49, %v94_v54  ;;  %v167_v11 = vld [vmem:[#allocation7 + $0x138] sm:$0xff]  ;;  %v185_v17 = vld [vmem:[#allocation7 + $0x1c8] sm:$0xff]  ;;  %v858_v19 = vpack.c.bf16 %v158_v5, %v154_v4  ;;  %p1084_p3 = pnand %p1083_p2, %p1077_p13 }
  0x54   :  { %827 = vmatpush1.bf16.msra.mxu0 %v826_v34  ;;  %v84_v6 = vld [vmem:[%s83_s21] sm:$0x1]  ;;  %v103_v7 = vrot.slane %v80_v50, 4  ;;  %v117_v8 = vsel %vm116_vm1, %v115_v1, %v97_v55  ;;  %v189_v18 = vld [vmem:[#allocation7 + $0x1e8] sm:$0xff]  ;;  %857 = vmatprep.subr.bf16.mxu1 %v856_v9  ;;  %v860_v22 = vpack.c.bf16 %v167_v11, %v163_v10  ;;  %v162_v23 = vld [vmem:[#allocation7 + $0x110] sm:$0xff] }
  0x55   :  { %829 = vmatprep.subr.bf16.mxu0 %v828_v39  ;;  %v176_v13 = vld [vmem:[#allocation7 + $0x180] sm:$0xff]  ;;  %v119_v14 = vsel %vm118_vm2, %v117_v8, %v100_v56  ;;  %v106_v21 = vrot.slane %v84_v6, 3  ;;  %v166_v24 = vld [vmem:[#allocation7 + $0x130] sm:$0xff]  ;;  %v171_v26 = vld [vmem:[#allocation7 + $0x158] sm:$0xff]  ;;  %v840_v29 = vpack.c.bf16 %v189_v18, %v185_v17 }
  0x56   :  { %v180_v16 = vld [vmem:[#allocation7 + $0x1a0] sm:$0xff]  ;;  %v121_v25 = vsel %vm120_vm3, %v119_v14, %v103_v7  ;;  %v175_v27 = vld [vmem:[#allocation7 + $0x178] sm:$0xff]  ;;  %859 = vmatpush1.bf16.msra.mxu1 %v858_v19  ;;  %v862_v34 = vpack.c.bf16 %v166_v24, %v162_v23  ;;  %v170_v37 = vld [vmem:[#allocation7 + $0x150] sm:$0xff] }
  0x57   :  { %v88_v20 = vld [vmem:[%s87_s2] sm:$0x1]  ;;  %v838_v28 = vpack.c.bf16 %v180_v16, %v176_v13  ;;  %v123_v35 = vsel %vm122_vm4, %v121_v25, %v106_v21  ;;  %861 = vmatprep.subr.bf16.mxu1 %v860_v22  ;;  %v864_v36 = vpack.c.bf16 %v175_v27, %v171_v26  ;;  %v174_v38 = vld [vmem:[#allocation7 + $0x170] sm:$0xff]  ;;  %v179_v39 = vld [vmem:[#allocation7 + $0x198] sm:$0xff] }
  0x58   :  { %831 = vmatpush1.bf16.msra.mxu0 %v830_v51  ;;  %v184_v30 = vld [vmem:[#allocation7 + $0x1c0] sm:$0xff]  ;;  %v109_v33 = vrot.slane %v88_v20, 2  ;;  %v183_v40 = vld [vmem:[#allocation7 + $0x1b8] sm:$0xff]  ;;  %v866_v44 = vpack.c.bf16 %v174_v38, %v170_v37  ;;  %v178_v46 = vld [vmem:[#allocation7 + $0x190] sm:$0xff] }
  0x59   :  { %833 = vmatprep.subr.bf16.mxu0 %v832_v59  ;;  %v188_v31 = vld [vmem:[#allocation7 + $0x1e0] sm:$0xff]  ;;  %v868_v45 = vpack.c.bf16 %v183_v40, %v179_v39  ;;  %v182_v47 = vld [vmem:[#allocation7 + $0x1b0] sm:$0xff]  ;;  %v187_v48 = vld [vmem:[#allocation7 + $0x1d8] sm:$0xff] }
  0x5a   :  { %v92_v32 = vld [vmem:[%s91_s22] sm:$0x1]  ;;  %v842_v41 = vpack.c.bf16 %v188_v31, %v184_v30  ;;  %v125_v43 = vsel %vm124_vm5, %v123_v35, %v109_v33  ;;  %863 = vmatpush1.bf16.msra.mxu1 %v862_v34  ;;  %v191_v49 = vld [vmem:[#allocation7 + $0x1f8] sm:$0xff]  ;;  %v870_v51 = vpack.c.bf16 %v182_v47, %v178_v46  ;;  %v186_v53 = vld [vmem:[#allocation7 + $0x1d0] sm:$0xff] }
  0x5b   :  { %v112_v42 = vrot.slane %v92_v32, 1  ;;  %865 = vmatprep.subr.bf16.mxu1 %v864_v36  ;;  %v872_v52 = vpack.c.bf16 %v191_v49, %v187_v48  ;;  %v190_v54 = vld [vmem:[#allocation7 + $0x1f0] sm:$0xff]  ;;  %v376_v56 = vld [vmem:[#allocation7 + $0x228] sm:$0xff]  ;;  %v378_v58 = vld [vmem:[#allocation7 + $0x238] sm:$0xff] }
  0x5c   :  { %835 = vmatpush1.bf16.msra.mxu0 %v834_v12  ;;  %v874_v55 = vpack.c.bf16 %v190_v54, %v186_v53  ;;  %v380_v57 = vld [vmem:[#allocation7 + $0x248] sm:$0xff]  ;;  %v382_v60 = vld [vmem:[#allocation7 + $0x258] sm:$0xff]  ;;  %v375_v61 = vld [vmem:[#allocation7 + $0x220] sm:$0xff] }
  0x5d   :  { %837 = vmatprep.subr.bf16.mxu0 %v836_v15  ;;  %v127_v50 = vsel %vm126_vm6, %v125_v43, %v112_v42  ;;  %v876_v59 = vpack.c.bf16 %v380_v57, %v376_v56  ;;  %v379_v62 = vld [vmem:[#allocation7 + $0x240] sm:$0xff]  ;;  %v908_v63 = vpack.c.bf16 %v382_v60, %v378_v58  ;;  %v377_v2 = vld [vmem:[#allocation7 + $0x230] sm:$0xff]  ;;  %v384_v5 = vld [vmem:[#allocation7 + $0x268] sm:$0xff] }
  0x5e   :  { %867 = vmatpush1.bf16.msra.mxu1 %v866_v44  ;;  %v878_v1 = vpack.c.bf16 %v379_v62, %v375_v61  ;;  %v381_v3 = vld [vmem:[#allocation7 + $0x250] sm:$0xff]  ;;  %v388_v6 = vld [vmem:[#allocation7 + $0x288] sm:$0xff]  ;;  %v386_v7 = vld [vmem:[#allocation7 + $0x278] sm:$0xff] }
  0x5f   :  { %869 = vmatprep.subr.bf16.mxu1 %v868_v45  ;;  %v910_v4 = vpack.c.bf16 %v381_v3, %v377_v2  ;;  %v880_v8 = vpack.c.bf16 %v388_v6, %v384_v5  ;;  %v390_v9 = vld [vmem:[#allocation7 + $0x298] sm:$0xff]  ;;  %v383_v10 = vld [vmem:[#allocation7 + $0x260] sm:$0xff]  ;;  %v385_v14 = vld [vmem:[#allocation7 + $0x270] sm:$0xff] }
  0x60   :  { %839 = vmatpush1.bf16.msra.mxu0 %v838_v28  ;;  %v387_v11 = vld [vmem:[#allocation7 + $0x280] sm:$0xff]  ;;  %v912_v12 = vpack.c.bf16 %v390_v9, %v386_v7  ;;  %v389_v15 = vld [vmem:[#allocation7 + $0x290] sm:$0xff]  ;;  %v392_v17 = vld [vmem:[#allocation7 + $0x2a8] sm:$0xff] }
  0x61   :  { %841 = vmatprep.subr.bf16.mxu0 %v840_v29  ;;  %v882_v13 = vpack.c.bf16 %v387_v11, %v383_v10  ;;  %v914_v16 = vpack.c.bf16 %v389_v15, %v385_v14  ;;  %v396_v18 = vld [vmem:[#allocation7 + $0x2c8] sm:$0xff]  ;;  %v394_v19 = vld [vmem:[#allocation7 + $0x2b8] sm:$0xff]  ;;  %v391_v22 = vld [vmem:[#allocation7 + $0x2a0] sm:$0xff] }
  0x62   :  { %871 = vmatpush1.bf16.msra.mxu1 %v870_v51  ;;  %v884_v20 = vpack.c.bf16 %v396_v18, %v392_v17  ;;  %v398_v21 = vld [vmem:[#allocation7 + $0x2d8] sm:$0xff]  ;;  %v395_v23 = vld [vmem:[#allocation7 + $0x2c0] sm:$0xff]  ;;  %v393_v26 = vld [vmem:[#allocation7 + $0x2b0] sm:$0xff] }
  0x63   :  { %873 = vmatprep.subr.bf16.mxu1 %v872_v52  ;;  %v916_v24 = vpack.c.bf16 %v398_v21, %v394_v19  ;;  %v886_v25 = vpack.c.bf16 %v395_v23, %v391_v22  ;;  %v397_v27 = vld [vmem:[#allocation7 + $0x2d0] sm:$0xff]  ;;  %v400_v29 = vld [vmem:[#allocation7 + $0x2e8] sm:$0xff]  ;;  %v402_v31 = vld [vmem:[#allocation7 + $0x2f8] sm:$0xff] }
  0x64   :  { %843 = vmatpush1.bf16.msra.mxu0 %v842_v41  ;;  %v918_v28 = vpack.c.bf16 %v397_v27, %v393_v26  ;;  %v404_v30 = vld [vmem:[#allocation7 + $0x308] sm:$0xff]  ;;  %v406_v33 = vld [vmem:[#allocation7 + $0x318] sm:$0xff]  ;;  %v399_v34 = vld [vmem:[#allocation7 + $0x2e0] sm:$0xff]  ;;  %v195_v26 = vlaneseq }
  0x65   :  { %877 = vmatprep.subr.bf16.mxu0 %v876_v59  ;;  %v888_v32 = vpack.c.bf16 %v404_v30, %v400_v29  ;;  %v403_v35 = vld [vmem:[#allocation7 + $0x300] sm:$0xff]  ;;  %v920_v36 = vpack.c.bf16 %v406_v33, %v402_v31  ;;  %v401_v38 = vld [vmem:[#allocation7 + $0x2f0] sm:$0xff]  ;;  %v408_v41 = vld [vmem:[#allocation7 + $0x328] sm:$0xff] }
  0x66   :  { %875 = vmatpush1.bf16.msra.mxu1 %v874_v55  ;;  %v890_v37 = vpack.c.bf16 %v403_v35, %v399_v34  ;;  %v405_v39 = vld [vmem:[#allocation7 + $0x310] sm:$0xff]  ;;  %v412_v42 = vld [vmem:[#allocation7 + $0x348] sm:$0xff]  ;;  %v410_v43 = vld [vmem:[#allocation7 + $0x338] sm:$0xff]  ;;  %v1222_v27 = vshrl.u32 %v195_v26, 7 }
  0x67   :  { %280 = vmatmul.mubr.f32.vlgmr.msra.gmra.mrb[0].mxu0 %v127_v50  ;;  %909 = vmatprep.subr.bf16.mxu1 %v908_v63  ;;  %v922_v40 = vpack.c.bf16 %v405_v39, %v401_v38  ;;  %v892_v44 = vpack.c.bf16 %v412_v42, %v408_v41  ;;  %v414_v45 = vld [vmem:[#allocation7 + $0x358] sm:$0xff]  ;;  %v407_v46 = vld [vmem:[#allocation7 + $0x320] sm:$0xff]  ;;  %v413_v51 = vld [vmem:[#allocation7 + $0x350] sm:$0xff] }
  0x68   :  { %526 = vmatprep.mubr.f32.mxu0 %v1114_v0  ;;  %879 = vmatpush1.bf16.msra.mxu0 %v878_v1  ;;  %v411_v47 = vld [vmem:[#allocation7 + $0x340] sm:$0xff]  ;;  %v924_v48 = vpack.c.bf16 %v414_v45, %v410_v43  ;;  %v416_v53 = vld [vmem:[#allocation7 + $0x368] sm:$0xff]  ;;  %v418_v55 = vld [vmem:[#allocation7 + $0x378] sm:$0xff]  ;;  %v201_v30 = vsub.s32 1, %v1222_v27  ;;  %v209_v43 = vsub.s32 3, %v1222_v27 }
  0x69   :  { %351 = vmatmul.mubr.f32.vlgmr.msra.gmra.mrb[0].mxu1 %v127_v50  ;;  %881 = vmatprep.subr.bf16.mxu0 %v880_v8  ;;  %v894_v49 = vpack.c.bf16 %v411_v47, %v407_v46  ;;  %v409_v50 = vld [vmem:[#allocation7 + $0x330] sm:$0xff]  ;;  %v420_v54 = vld [vmem:[#allocation7 + $0x388] sm:$0xff]  ;;  %v422_v57 = vld [vmem:[#allocation7 + $0x398] sm:$0xff] }
  0x6a   :  { %597 = vmatprep.mubr.f32.mxu1 %v1114_v0  ;;  %911 = vmatpush1.bf16.msra.mxu1 %v910_v4  ;;  %v926_v52 = vpack.c.bf16 %v413_v51, %v409_v50  ;;  %v896_v56 = vpack.c.bf16 %v420_v54, %v416_v53  ;;  %v415_v58 = vld [vmem:[#allocation7 + $0x360] sm:$0xff]  ;;  %v928_v60 = vpack.c.bf16 %v422_v57, %v418_v55  ;;  %v417_v62 = vld [vmem:[#allocation7 + $0x370] sm:$0xff]  ;;  %v424_v1 = vld [vmem:[#allocation7 + $0x3a8] sm:$0xff] }
  0x6b   :  { %913 = vmatprep.subr.bf16.mxu1 %v912_v12  ;;  %v419_v59 = vld [vmem:[#allocation7 + $0x380] sm:$0xff]  ;;  %v421_v63 = vld [vmem:[#allocation7 + $0x390] sm:$0xff]  ;;  %v428_v3 = vld [vmem:[#allocation7 + $0x3c8] sm:$0xff] }
  0x6c   :  { %883 = vmatpush1.bf16.msra.mxu0 %v882_v13  ;;  %v898_v61 = vpack.c.bf16 %v419_v59, %v415_v58  ;;  %v930_v2 = vpack.c.bf16 %v421_v63, %v417_v62  ;;  %v426_v4 = vld [vmem:[#allocation7 + $0x3b8] sm:$0xff]  ;;  %v900_v6 = vpack.c.bf16 %v428_v3, %v424_v1  ;;  %v423_v8 = vld [vmem:[#allocation7 + $0x3a0] sm:$0xff]  ;;  %v425_v10 = vld [vmem:[#allocation7 + $0x3b0] sm:$0xff] }
  0x6d   :  { %885 = vmatprep.subr.bf16.mxu0 %v884_v20  ;;  %v430_v5 = vld [vmem:[#allocation7 + $0x3d8] sm:$0xff]  ;;  %v427_v9 = vld [vmem:[#allocation7 + $0x3c0] sm:$0xff]  ;;  %v429_v12 = vld [vmem:[#allocation7 + $0x3d0] sm:$0xff] }
  0x6e   :  { %915 = vmatpush1.bf16.msra.mxu1 %v914_v16  ;;  %v932_v7 = vpack.c.bf16 %v430_v5, %v426_v4  ;;  %v902_v11 = vpack.c.bf16 %v427_v9, %v423_v8  ;;  %v432_v13 = vld [vmem:[#allocation7 + $0x3e8] sm:$0xff]  ;;  %v934_v15 = vpack.c.bf16 %v429_v12, %v425_v10  ;;  %v434_v17 = vld [vmem:[#allocation7 + $0x3f8] sm:$0xff]  ;;  %v431_v19 = vld [vmem:[#allocation7 + $0x3e0] sm:$0xff] }
  0x6f   :  { %917 = vmatprep.subr.bf16.mxu1 %v916_v24  ;;  %v436_v14 = vld [vmem:[#allocation7 + $0x408] sm:$0xff]  ;;  %v438_v18 = vld [vmem:[#allocation7 + $0x418] sm:$0xff]  ;;  %v435_v21 = vld [vmem:[#allocation7 + $0x400] sm:$0xff] }
  0x70   :  { %887 = vmatpush1.bf16.msra.mxu0 %v886_v25  ;;  %v904_v16 = vpack.c.bf16 %v436_v14, %v432_v13  ;;  %v936_v20 = vpack.c.bf16 %v438_v18, %v434_v17  ;;  %v433_v22 = vld [vmem:[#allocation7 + $0x3f0] sm:$0xff]  ;;  %v906_v24 = vpack.c.bf16 %v435_v21, %v431_v19  ;;  %v621_v58 = vld [vmem:[#allocation9] sm:$0xff]  ;;  %v622_v59 = vld [vmem:[#allocation9 + $0x8] sm:$0xff] }
  0x71   :  { %889 = vmatprep.subr.bf16.mxu0 %v888_v32  ;;  %v437_v23 = vld [vmem:[#allocation7 + $0x410] sm:$0xff]  ;;  %v624_v63 = vld [vmem:[#allocation9 + $0x18] sm:$0xff]  ;;  %v626_v3 = vld [vmem:[#allocation9 + $0x28] sm:$0xff] }
  0x72   :  { %919 = vmatpush1.bf16.msra.mxu1 %v918_v28  ;;  %v938_v25 = vpack.c.bf16 %v437_v23, %v433_v22  ;;  %v197_v28 = vsub.s32 0, %v1222_v27  ;;  %v193_v29 = vld [vmem:[#allocation7 + $0x200] ss:$8 sm:$0xf] }
  0x73   :  { %921 = vmatprep.subr.bf16.mxu1 %v920_v36  ;;  %v202_v33 = vrot.slane %v193_v29, %v201_v30  ;;  %v210_v45 = vrot.slane %v193_v29, %v209_v43  ;;  %v623_v62 = vld [vmem:[#allocation9 + $0x10] sm:$0xff]  ;;  %v629_v8 = vld [vmem:[#allocation9 + $0x40] sm:$0xff]  ;;  %v630_v9 = vld [vmem:[#allocation9 + $0x48] sm:$0xff] }
  0x74   :  { %891 = vmatpush1.bf16.msra.mxu0 %v890_v37  ;;  %v198_v31 = vrot.slane %v193_v29, %v197_v28  ;;  %v944_v1 = vpack.c.bf16 %v624_v63, %v623_v62  ;;  %v627_v5 = vld [vmem:[#allocation9 + $0x30] sm:$0xff]  ;;  %v953_v10 = vpack.c.bf16 %v630_v9, %v629_v8  ;;  %v632_v12 = vld [vmem:[#allocation9 + $0x58] sm:$0xff]  ;;  %v633_v14 = vld [vmem:[#allocation9 + $0x60] sm:$0xff] }
  0x75   :  { %893 = vmatprep.subr.bf16.mxu0 %v892_v44  ;;  %v205_v44 = vsub.s32 2, %v1222_v27  ;;  %v635_v17 = vld [vmem:[#allocation9 + $0x70] sm:$0xff]  ;;  %v636_v18 = vld [vmem:[#allocation9 + $0x78] sm:$0xff] }
  0x76   :  { %923 = vmatpush1.bf16.msra.mxu1 %v922_v40  ;;  %v962_v19 = vpack.c.bf16 %v636_v18, %v635_v17 }
  0x77   :  { %925 = vmatprep.subr.bf16.mxu1 %v924_v48  ;;  %v206_v48 = vrot.slane %v193_v29, %v205_v44 }
  0x78   :  { %895 = vmatpush1.bf16.msra.mxu0 %v894_v49 }
  0x79   :  { %897 = vmatprep.subr.bf16.mxu0 %v896_v56 }
  0x7a   :  { %927 = vmatpush1.bf16.msra.mxu1 %v926_v52 }
  0x7b   :  { %929 = vmatprep.subr.bf16.mxu1 %v928_v60  ;;  %v941_v60 = vpack.c.bf16 %v622_v59, %v621_v58 }
  0x7c   :  { %899 = vmatpush1.bf16.msra.mxu0 %v898_v61  ;;  %v1115_v61 = vmov 0.0|0.0  }
  0x7d   :  { %901 = vmatprep.subr.bf16.mxu0 %v900_v6  ;;  %v628_v6 = vld [vmem:[#allocation9 + $0x38] sm:$0xff] }
  0x7e   :  { %931 = vmatpush1.bf16.msra.mxu1 %v930_v2  ;;  %v625_v2 = vld [vmem:[#allocation9 + $0x20] sm:$0xff] }
  0x7f   :  { %933 = vmatprep.subr.bf16.mxu1 %v932_v7  ;;  %v947_v4 = vpack.c.bf16 %v626_v3, %v625_v2  ;;  %v950_v7 = vpack.c.bf16 %v628_v6, %v627_v5 }
  0x80   :  { %903 = vmatpush1.bf16.msra.mxu0 %v902_v11  ;;  %v631_v11 = vld [vmem:[#allocation9 + $0x50] sm:$0xff] }
  0x81   :  { %905 = vmatprep.subr.bf16.mxu0 %v904_v16  ;;  %v956_v13 = vpack.c.bf16 %v632_v12, %v631_v11 }
  0x82   :  { %935 = vmatpush1.bf16.msra.mxu1 %v934_v15  ;;  %v634_v15 = vld [vmem:[#allocation9 + $0x68] sm:$0xff] }
  0x83   :  { %937 = vmatprep.subr.bf16.mxu1 %v936_v20  ;;  %v959_v16 = vpack.c.bf16 %v634_v15, %v633_v14  ;;  %v440_v20 = vld [vmem:[#allocation7 + $0x420] ss:$8 sm:$0xf] }
  0x84   :  { %907 = vmatpush1.bf16.msra.mxu0 %v906_v24  ;;  %v445_v21 = vrot.slane %v440_v20, %v197_v28  ;;  %v449_v24 = vrot.slane %v440_v20, %v201_v30  ;;  %v457_v28 = vrot.slane %v440_v20, %v209_v43 }
  0x85   :  { %940 = vmatprep.subr.bf16.mxu0 %v1115_v61 }
  0x86   :  { %939 = vmatpush1.bf16.msra.mxu1 %v938_v25 }
 0x13a   :  { %v281_v32 = vpop.f32.mrb[0].mxu0 }
 0x13b   :  { %v282_v34 = vadd.f32 %v281_v32, %v198_v31  ;;  %v283_v35 = vpop.f32.mrb[1].mxu0 }
 0x13c   :  { %v284_v37 = vadd.f32 %v283_v35, %v202_v33  ;;  %v352_v39 = vpop.f32.mrb[0].mxu1 }
 0x13d   :  { %v755_v36 = vmul.f32 -1.442695, %v282_v34  ;;  %v354_v40 = vpop.f32.mrb[1].mxu1  ;;  %v353_v51 = vadd.f32 %v352_v39, %v206_v48  ;;  %v759_v48 = vld [vmem:[#allocation9 + $0x80] ss:$0 sm:$0xff] }
 0x13e   :  { %v756_v38 = vmul.f32 -1.442695, %v284_v37  ;;  %v355_v49 = vadd.f32 %v354_v40, %v210_v45 }
 0x13f   :  { %976 = vpow2.f32 %v755_v36  ;;  %v453_v36 = vrot.slane %v440_v20, %v205_v44 }
 0x140   :  { %978 = vpow2.f32 %v756_v38 }
 0x149   :  { %v977_v41 = vpop.eup %976 }
 0x14a   :  { %v360_v42 = vadd.f32 1.0, %v977_v41  ;;  %v979_v46 = vpop.eup %978 }
 0x14b   :  { %v366_v47 = vadd.f32 1.0, %v979_v46 }
 0x14c   :  { %980 = vrcp.f32 %v360_v42 }
 0x14d   :  { %982 = vrcp.f32 %v366_v47 }
 0x156   :  { %v981_v50 = vpop.eup %980 }
 0x157   :  { %v369_v52 = vmul.f32 %v981_v50, %v355_v49  ;;  %v983_v54 = vpop.eup %982 }
 0x158   :  { %v372_v55 = vsub.f32 1.0, %v983_v54 }
 0x159   :  { %v370_v53 = vadd.f32 %v369_v52, %v353_v51 }
 0x15b   :  { %984 = vtanh.f32 %v370_v53 }
 0x165   :  { %v985_v56 = vpop.eup %984 }
 0x166   :  { %v373_v57 = vmul.f32 %v985_v56, %v372_v55 }
 0x168   :  { %527 = vmatmul.mubr.f32.vlgmr.msra.gmra.mrb[2].mxu0 %v373_v57  ;;  %598 = vmatmul.mubr.f32.vlgmr.msra.gmra.mrb[2].mxu1 %v373_v57 }
 0x169   :  { %942 = vmatpush3.bf16.msra.mxu0 %v941_v60  ;;  %809 = vmatprep.mubr.msk.f32.mxu0 %vm1116_vm7, %v1114_v0 }
 0x16a   :  { %943 = vmatprep.subr.bf16.mxu0 %v1115_v61 }
 0x16d   :  { %945 = vmatpush3.bf16.msra.mxu0 %v944_v1 }
 0x16e   :  { %946 = vmatprep.subr.bf16.mxu0 %v1115_v61 }
 0x171   :  { %948 = vmatpush3.bf16.msra.mxu0 %v947_v4 }
 0x172   :  { %949 = vmatprep.subr.bf16.mxu0 %v1115_v61 }
 0x175   :  { %951 = vmatpush3.bf16.msra.mxu0 %v950_v7 }
 0x176   :  { %952 = vmatprep.subr.bf16.mxu0 %v1115_v61 }
 0x179   :  { %954 = vmatpush3.bf16.msra.mxu0 %v953_v10 }
 0x17a   :  { %955 = vmatprep.subr.bf16.mxu0 %v1115_v61 }
 0x17d   :  { %957 = vmatpush3.bf16.msra.mxu0 %v956_v13 }
 0x17e   :  { %958 = vmatprep.subr.bf16.mxu0 %v1115_v61 }
 0x181   :  { %960 = vmatpush3.bf16.msra.mxu0 %v959_v16 }
 0x182   :  { %961 = vmatprep.subr.bf16.mxu0 %v1115_v61 }
 0x185   :  { %963 = vmatpush3.bf16.msra.mxu0 %v962_v19 }
 0x23b   :  { %v528_v22 = vpop.f32.mrb[2].mxu0  ;;  %v599_v23 = vpop.f32.mrb[2].mxu1 }
 0x23c   :  { %v529_v25 = vadd.f32 %v528_v22, %v445_v21  ;;  %v530_v0 = vpop.f32.mrb[3].mxu0  ;;  %v601_v26 = vpop.f32.mrb[3].mxu1  ;;  %v600_v39 = vadd.f32 %v599_v23, %v453_v36 }
 0x23d   :  { %v531_v31 = vadd.f32 %v530_v0, %v449_v24  ;;  %v602_v30 = vadd.f32 %v601_v26, %v457_v28 }
 0x23e   :  { %v757_v29 = vmul.f32 -1.442695, %v529_v25 }
 0x23f   :  { %v758_v32 = vmul.f32 -1.442695, %v531_v31 }
 0x240   :  { %986 = vpow2.f32 %v757_v29 }
 0x241   :  { %988 = vpow2.f32 %v758_v32 }
 0x24a   :  { %v987_v33 = vpop.eup %986 }
 0x24b   :  { %v607_v34 = vadd.f32 1.0, %v987_v33  ;;  %v989_v35 = vpop.eup %988 }
 0x24c   :  { %v613_v37 = vadd.f32 1.0, %v989_v35 }
 0x24d   :  { %990 = vrcp.f32 %v607_v34 }
 0x24e   :  { %992 = vrcp.f32 %v613_v37 }
 0x257   :  { %v991_v38 = vpop.eup %990 }
 0x258   :  { %v616_v40 = vmul.f32 %v991_v38, %v602_v30  ;;  %v993_v42 = vpop.eup %992 }
 0x259   :  { %v619_v45 = vsub.f32 1.0, %v993_v42 }
 0x25a   :  { %v617_v41 = vadd.f32 %v616_v40, %v600_v39 }
 0x25c   :  { %994 = vtanh.f32 %v617_v41 }
 0x266   :  { %v995_v46 = vpop.eup %994 }
 0x267   :  { %v620_v47 = vmul.f32 %v995_v46, %v619_v45 }
 0x269   :  { %810 = vmatmul.mubr.f32.vlgmr.msra.gmra.mrb[4].mxu0 %v620_v47 }
 0x33c   :  { %v708_v49 = vpop.f32.mrb[4].mxu0 }
 0x33d   :  { %v709_v50 = vadd.f32 %v759_v48, %v708_v49  ;;  %v811_v43 = vpop.f32.mrb[5].mxu0 }
 0x33f   :  { %712 = vmax.xlane.f32.xlu0 %v709_v50 }
 0x3cc   :  { %v713_v27 = vpop.xlane.xlu0 %712 }
 0x3cd   :  { %v714_v44 = vsub.f32 %v709_v50, %v713_v27 }
 0x3cf   :  { %v715_v51 = vmul.f32 1.442695, %v714_v44 }
 0x3d1   :  { %996 = vpow2.f32 %v715_v51 }
 0x3db   :  { %v997_v52 = vpop.eup %996 }
 0x3dc   :  { %717 = vadd.xlane.f32.xlu0 %v997_v52 }
 0x469   :  { %v718_v53 = vpop.xlane.xlu0 %717 }
 0x46a   :  { %998 = vlog2.f32 %v718_v53 }
 0x474   :  { %v999_v54 = vpop.eup %998 }
 0x475   :  { %v720_v55 = vmul.f32 0.6931472, %v999_v54 }
 0x477   :  { %v721_v56 = vsub.f32 %v714_v44, %v720_v55 }
 0x479   :  { %722 = vst [vmem:[#allocation10] sm:$0xff] %v721_v56 }
 0x47a   :  { %1087 = shalt.err (!%p1084_p3)
}
 0x47b   :  { %s1088_s28 = scalar_lea.hbm %s1261_s4, 128 }
 0x47c   :  { %p1089_p4 = scmp.ne.s32.totalorder %s1261_s4, %s1088_s28  ;;  %p1092_p5 = scmp.lt.u32.totalorder %s1088_s28, %s1261_s4 }
 0x47e   :  { %p1094_p6 = pnand %p1092_p5, %p1089_p4 }
 0x480   :  { %1097 = shalt.err (!%p1094_p6)
}
 0x481   :  { %732 = dma.vmem_to_hbm [thread:$0]  %s730_s24, 128, %s1261_s4, [#allocation6]  }
 0x482   :  { %1104 = dma.done.wait [#allocation6], 128  }
 0x483   :  { %1105 = vsyncadd [#allocation6], 4294967168 }
 0x484   :  { %736 = vsyncpa [#allocation5], 1 }
 0x485   :  { %737 = vsyncpa [#allocation8], 1 }
 0x486   :  { %738 = vsyncpa [#allocation6], 1 }

</bundles_post_ra>
